<compile_context>
chip_gen: v7x
topology: tpu7x:2x2x1
jax: 0.10.0
libtpu: 0.0.40
codegen_flags: <defaults>
</compile_context>

<pallas_src>
import jax
import jax.numpy as jnp
import numpy as np
from jax.experimental import pallas as pl
from jax.experimental.pallas import tpu as pltpu

TAU = 2.0      # spikingjelly LIFNode default
V_TH = 1.0     # v_threshold
V_RESET = 0.0  # hard reset value
BN_EPS = 1e-5  # torch BatchNorm2d default
_HIGHEST = jax.lax.Precision.HIGHEST


def _smlp_kernel(x_ref, wh_ref, bh_ref, ww_ref, bw_ref,
                 wfx_ref, wfh_ref, wfw_ref, bf_ref, o_ref):
    """One batch block, all T time steps.

    x_ref   : (T, R, S)   R = b_blk*C rows (b-major, c-minor), S = H*W lanes (h-major, w-minor)
    wh_ref  : (S, S)      kron(wh_folded^T, I_W)  -- H-mix 1x1 conv in slab lane layout
    ww_ref  : (S, S)      kron(I_H, ww_folded^T)  -- W-mix 1x1 conv in slab lane layout
    bh_ref, bw_ref : (1, S)   folded branch biases (broadcast over rows)
    wfx/wfh/wfw_ref: (R_out, R) fuse 1x1 conv, block-diagonal over the batch block
    bf_ref  : (R_out, 1)  folded fuse bias
    o_ref   : (T, R_out, S)
    """
    T = x_ref.shape[0]
    R, S = x_ref.shape[1], x_ref.shape[2]
    inv_tau = 1.0 / TAU

    wh = wh_ref[...]
    ww = ww_ref[...]
    bh = bh_ref[...]
    bw = bw_ref[...]
    wfx = wfx_ref[...]
    wfh = wfh_ref[...]
    wfw = wfw_ref[...]
    bf = bf_ref[...]

    def step(t, carry):
        vh, vw = carry                                       # f32 membranes (vregs)
        x = x_ref[t]                                         # (R, S), compute dtype

        # ---- proj_h: folded 1x1 conv mixing H (one lane-dense MXU matmul) + LIF ----
        yh = jnp.dot(x, wh, preferred_element_type=jnp.float32) + bh
        vh = vh + (yh - vh) * inv_tau                        # charge (decay_input=True)
        fh = vh >= V_TH                                      # fire
        vh = jnp.where(fh, V_RESET, vh)                      # hard reset (v_reset = 0)
        sh = fh.astype(jnp.float32).astype(x.dtype)          # spikes (exact in bf16)

        # ---- proj_w: folded 1x1 conv mixing W (one lane-dense MXU matmul) + LIF ----
        yw = jnp.dot(x, ww, preferred_element_type=jnp.float32) + bw
        vw = vw + (yw - vw) * inv_tau
        fw = vw >= V_TH
        vw = jnp.where(fw, V_RESET, vw)
        sw = fw.astype(jnp.float32).astype(x.dtype)

        # ---- fuse: 1x1 conv over concat([x, x_h, x_w], channel) + BN, folded ----
        out = jnp.dot(wfx, x, preferred_element_type=jnp.float32)
        out = out + jnp.dot(wfh, sh, preferred_element_type=jnp.float32)
        out = out + jnp.dot(wfw, sw, preferred_element_type=jnp.float32)
        o_ref[t] = (out + bf).astype(o_ref.dtype)
        return vh, vw

    v0 = jnp.zeros((R, S), jnp.float32)
    _ = jax.lax.fori_loop(0, T, step, (v0, v0), unroll=True)


def smlp_block(x, wh_f, bh_f, ww_f, bw_f, wf_f, bf_f, out_channels,
               b_blk=None, compute_dtype=jnp.bfloat16, out_dtype=jnp.float32):
    """sMLPBlock forward (eval mode, BN folded into the 1x1 convs).

    x    : (T, B, C, H, W) float32
    wh_f : (H, H) folded proj_h weight, bh_f (H,)  folded bias
    ww_f : (W, W) folded proj_w weight, bw_f (W,)
    wf_f : (out_channels, 3*C) folded fuse weight ([x | x_h | x_w]), bf_f (out_channels,)
    """
    T, B, C, H, W = x.shape
    if b_blk is None or b_blk > B:
        b_blk = B            # v7x: pass b_blk = B // 2 so NB >= 2 and both TensorCores are used
    assert B % b_blk == 0, "b_blk must divide B"
    NB = B // b_blk
    S = H * W
    R = b_blk * C
    R_out = b_blk * out_channels

    # ---- slab view: (T, B, C, H, W) -> (T, NB, b_blk*C, H*W); pure reshape, no transpose ----
    x_slab = x.reshape(T, NB, R, S).astype(compute_dtype)

    # ---- Kronecker-expand the BN-folded weights into the slab lane / row layouts ----
    f32 = jnp.float32
    # out lane p*W + w  <-  sum_h  (x lane h*W + w) * wh_f[p, h]
    wh_big = jnp.kron(wh_f.T, jnp.eye(W, dtype=f32)).astype(compute_dtype)       # (S, S)
    bh_big = jnp.repeat(bh_f.astype(f32), W).reshape(1, S)
    # out lane h*W + q  <-  sum_w  (x lane h*W + w) * ww_f[q, w]
    ww_big = jnp.kron(jnp.eye(H, dtype=f32), ww_f.T).astype(compute_dtype)       # (S, S)
    bw_big = jnp.tile(bw_f.astype(f32), H).reshape(1, S)
    # fuse rows (b, c) -> (b, o): block-diagonal over the batch block
    eye_b = jnp.eye(b_blk, dtype=f32)
    wfx_big = jnp.kron(eye_b, wf_f[:, :C]).astype(compute_dtype)                 # (R_out, R)
    wfh_big = jnp.kron(eye_b, wf_f[:, C:2 * C]).astype(compute_dtype)
    wfw_big = jnp.kron(eye_b, wf_f[:, 2 * C:]).astype(compute_dtype)
    bf_big = jnp.tile(bf_f.astype(f32), b_blk).reshape(R_out, 1)

    out_slab = pl.pallas_call(
        _smlp_kernel,
        out_shape=jax.ShapeDtypeStruct((T, NB, R_out, S), out_dtype),
        grid=(NB,),
        in_specs=[
            pl.BlockSpec((T, None, R, S), lambda nb: (0, nb, 0, 0)),   # x slab (whole T block)
            pl.BlockSpec((S, S), lambda nb: (0, 0)),                   # H-mix weight
            pl.BlockSpec((1, S), lambda nb: (0, 0)),                   # H-mix bias
            pl.BlockSpec((S, S), lambda nb: (0, 0)),                   # W-mix weight
            pl.BlockSpec((1, S), lambda nb: (0, 0)),                   # W-mix bias
            pl.BlockSpec((R_out, R), lambda nb: (0, 0)),               # fuse weight (x part)
            pl.BlockSpec((R_out, R), lambda nb: (0, 0)),               # fuse weight (x_h part)
            pl.BlockSpec((R_out, R), lambda nb: (0, 0)),               # fuse weight (x_w part)
            pl.BlockSpec((R_out, 1), lambda nb: (0, 0)),               # fuse bias
        ],
        out_specs=pl.BlockSpec((T, None, R_out, S), lambda nb: (0, nb, 0, 0)),
        compiler_params=pltpu.CompilerParams(
            # The whole T axis lives inside the kernel, so there is no cross-grid-step
            # state and the batch-block axis is truly parallel (v7x megacore shards it).
            dimension_semantics=("parallel",),
            vmem_limit_bytes=64 * 1024 * 1024),
    )(x_slab, wh_big, bh_big, ww_big, bw_big, wfx_big, wfh_big, wfw_big, bf_big)

    # decode: (T, NB, b_blk*C_out, H*W) -> (T, B, C_out, H, W); pure reshape again
    return out_slab.reshape(T, B, out_channels, H, W)


# ------------------------- pure-JAX references (eval mode) -------------------------
def _lif(y):
    """LIF over the leading time axis: tau=2, v_th=1, hard reset to 0, decay_input=True."""
    def step(v, yt):
        v = v + (yt - v) / TAU
        s = (v >= V_TH).astype(jnp.float32)
        return jnp.where(s > 0, V_RESET, v), s
    _, s = jax.lax.scan(step, jnp.zeros_like(y[0]), y)
    return s


def reference_forward(x, p):
    """Faithful eval-mode reference of the PyTorch module (BN not folded)."""
    def bn(y, g, b, m, v, axis):
        shp = [1] * y.ndim
        shp[axis] = -1
        return (y - m.reshape(shp)) / jnp.sqrt(v.reshape(shp) + BN_EPS) \
            * g.reshape(shp) + b.reshape(shp)

    yh = jnp.einsum('ph,tbchw->tbcpw', p['wh'], x, precision=_HIGHEST) \
        + p['bh'][None, None, None, :, None]
    sh = _lif(bn(yh, p['gh'], p['beh'], p['mh'], p['rvh'], axis=3))
    yw = jnp.einsum('qw,tbchw->tbchq', p['ww'], x, precision=_HIGHEST) \
        + p['bw'][None, None, None, None, :]
    sw = _lif(bn(yw, p['gw'], p['bew'], p['mw'], p['rvw'], axis=4))
    cat = jnp.concatenate([x, sh, sw], axis=2)
    out = jnp.einsum('oi,tbihw->tbohw', p['wf'], cat, precision=_HIGHEST)
    return bn(out, p['gf'], p['bef'], p['mf'], p['rvf'], axis=2)


def folded_reference(x, wh_f, bh_f, ww_f, bw_f, wf_f, bf_f, compute_dtype=jnp.float32):
    """BN-folded forward with MXU operands rounded to `compute_dtype` (f32 accumulation),
    mirroring the kernel's numerics exactly up to summation order."""
    q = lambda a: a.astype(compute_dtype).astype(jnp.float32)
    xq = q(x)
    yh = jnp.einsum('ph,tbchw->tbcpw', q(wh_f), xq, precision=_HIGHEST) \
        + bh_f[None, None, None, :, None]
    sh = _lif(yh)
    yw = jnp.einsum('qw,tbchw->tbchq', q(ww_f), xq, precision=_HIGHEST) \
        + bw_f[None, None, None, None, :]
    sw = _lif(yw)
    cat = jnp.concatenate([xq, sh, sw], axis=2)
    out = jnp.einsum('oi,tbihw->tbohw', q(wf_f), cat, precision=_HIGHEST)
    return out + bf_f[None, None, :, None, None]


def fold_bn(p):
    """Fold eval-mode BatchNorm (running stats) into the 1x1-conv weights / biases."""
    sch = p['gh'] / jnp.sqrt(p['rvh'] + BN_EPS)
    wh_f = sch[:, None] * p['wh']
    bh_f = sch * (p['bh'] - p['mh']) + p['beh']
    scw = p['gw'] / jnp.sqrt(p['rvw'] + BN_EPS)
    ww_f = scw[:, None] * p['ww']
    bw_f = scw * (p['bw'] - p['mw']) + p['bew']
    scf = p['gf'] / jnp.sqrt(p['rvf'] + BN_EPS)
    wf_f = scf[:, None] * p['wf']
    bf_f = p['bef'] - scf * p['mf']
    return wh_f, bh_f, ww_f, bw_f, wf_f, bf_f


if __name__ == "__main__":
    T, B, C_in, H, W = 2, 2, 4, 16, 16
    C_out = 8
    f32 = jnp.float32

    key = jax.random.PRNGKey(0)
    ks = jax.random.split(key, 20)
    x = jax.random.uniform(ks[0], (T, B, C_in, H, W), dtype=f32)

    p = dict(
        # proj_h: Conv2d(H, H, 1x1) + BatchNorm2d(H)   (eval-mode running stats)
        wh=(0.4 * jax.random.normal(ks[1], (H, H))).astype(f32),
        bh=(0.1 * jax.random.normal(ks[2], (H,))).astype(f32),
        gh=(1.0 + 0.1 * jax.random.normal(ks[3], (H,))).astype(f32),
        beh=(1.5 + 0.2 * jax.random.normal(ks[4], (H,))).astype(f32),
        mh=(0.1 * jax.random.normal(ks[5], (H,))).astype(f32),
        rvh=(1.0 + 0.1 * jax.random.uniform(ks[6], (H,))).astype(f32),
        # proj_w: Conv2d(W, W, 1x1) + BatchNorm2d(W)
        ww=(0.4 * jax.random.normal(ks[7], (W, W))).astype(f32),
        bw=(0.1 * jax.random.normal(ks[8], (W,))).astype(f32),
        gw=(1.0 + 0.1 * jax.random.normal(ks[9], (W,))).astype(f32),
        bew=(1.5 + 0.2 * jax.random.normal(ks[10], (W,))).astype(f32),
        mw=(0.1 * jax.random.normal(ks[11], (W,))).astype(f32),
        rvw=(1.0 + 0.1 * jax.random.uniform(ks[12], (W,))).astype(f32),
        # fuse: Conv2d(3*C_in, C_out, 1x1, bias=False) + BatchNorm2d(C_out)
        wf=(0.3 * jax.random.normal(ks[13], (C_out, 3 * C_in))).astype(f32),
        gf=(1.0 + 0.1 * jax.random.normal(ks[14], (C_out,))).astype(f32),
        bef=(0.1 * jax.random.normal(ks[15], (C_out,))).astype(f32),
        mf=(0.1 * jax.random.normal(ks[16], (C_out,))).astype(f32),
        rvf=(1.0 + 0.1 * jax.random.uniform(ks[17], (C_out,))).astype(f32),
    )

    folded = fold_bn(p)
    ref = reference_forward(x, p)

    def mismatch_fraction(out, ref_arr, tol):
        out = np.asarray(out, dtype=np.float64)
        ref_arr = np.asarray(ref_arr, dtype=np.float64)
        return float(np.mean(np.abs(out - ref_arr) > tol * (1.0 + np.abs(ref_arr))))

    # LIF hard thresholding amplifies tiny matmul ordering/precision differences into
    # flipped spikes, so checks use a small mismatch-fraction budget instead of allclose.

    # 0) BN folding (pure JAX, f32) vs the faithful unfolded reference.
    frac0 = mismatch_fraction(folded_reference(x, *folded, compute_dtype=f32), ref, 1e-3)
    assert frac0 < 5e-3, f"folded reference mismatch fraction: {frac0}"

    # 1) bf16-operand kernel (default fast path) vs a bf16-consistent folded reference.
    out_bf16 = jax.block_until_ready(smlp_block(x, *folded, C_out))
    ref_bf16 = folded_reference(x, *folded, compute_dtype=jnp.bfloat16)
    frac1 = mismatch_fraction(out_bf16, ref_bf16, 1e-3)
    assert frac1 < 5e-3, f"bf16 kernel mismatch fraction: {frac1}"

    # 2) f32-operand kernel vs the original module reference (looser: MXU f32 emulation
    #    vs XLA HIGHEST may differ slightly, and spike flips propagate over T).
    out_f32 = jax.block_until_ready(smlp_block(x, *folded, C_out, compute_dtype=f32))
    frac2 = mismatch_fraction(out_f32, ref, 1e-2)
    assert frac2 < 5e-2, f"f32 kernel mismatch fraction: {frac2}"

    print("KERNEL_OK")
</pallas_src>

<mosaic_0001>
module attributes {stable_mosaic.version = 11 : i64} {
  func.func @_smlp_kernel(%arg0: i32, %arg1: memref<2x1x8x256xbf16, #tpu.memory_space<vmem>>, %arg2: memref<256x256xbf16, #tpu.memory_space<vmem>>, %arg3: memref<1x256xf32, #tpu.memory_space<vmem>>, %arg4: memref<256x256xbf16, #tpu.memory_space<vmem>>, %arg5: memref<1x256xf32, #tpu.memory_space<vmem>>, %arg6: memref<16x8xbf16, #tpu.memory_space<vmem>>, %arg7: memref<16x8xbf16, #tpu.memory_space<vmem>>, %arg8: memref<16x8xbf16, #tpu.memory_space<vmem>>, %arg9: memref<16x1xf32, #tpu.memory_space<vmem>>, %arg10: memref<2x1x16x256xf32, #tpu.memory_space<vmem>>) attributes {dimension_semantics = [#tpu.dimension_semantics<parallel>], iteration_bounds = array<i64: 1>, scalar_prefetch = 0 : i64, scratch_operands = 0 : i64, tpu.core_type = #tpu.core_type<tc>, window_params = [{transform_indices = @transform_0, window_bounds = array<i64: 2, 1, 8, 256>}, {pipeline_mode = #tpu.pipeline_mode<synchronous>, transform_indices = @transform_1, window_bounds = array<i64: 256, 256>}, {pipeline_mode = #tpu.pipeline_mode<synchronous>, transform_indices = @transform_2, window_bounds = array<i64: 1, 256>}, {pipeline_mode = #tpu.pipeline_mode<synchronous>, transform_indices = @transform_3, window_bounds = array<i64: 256, 256>}, {pipeline_mode = #tpu.pipeline_mode<synchronous>, transform_indices = @transform_4, window_bounds = array<i64: 1, 256>}, {pipeline_mode = #tpu.pipeline_mode<synchronous>, transform_indices = @transform_5, window_bounds = array<i64: 16, 8>}, {pipeline_mode = #tpu.pipeline_mode<synchronous>, transform_indices = @transform_6, window_bounds = array<i64: 16, 8>}, {pipeline_mode = #tpu.pipeline_mode<synchronous>, transform_indices = @transform_7, window_bounds = array<i64: 16, 8>}, {pipeline_mode = #tpu.pipeline_mode<synchronous>, transform_indices = @transform_8, window_bounds = array<i64: 16, 1>}, {transform_indices = @transform_9, window_bounds = array<i64: 2, 1, 16, 256>}]} {
    %c0 = arith.constant 0 : index
    %c0_0 = arith.constant 0 : index
    %0 = vector.load %arg2[%c0, %c0_0] : memref<256x256xbf16, #tpu.memory_space<vmem>>, vector<256x256xbf16>
    %c0_1 = arith.constant 0 : index
    %c0_2 = arith.constant 0 : index
    %1 = vector.load %arg4[%c0_1, %c0_2] : memref<256x256xbf16, #tpu.memory_space<vmem>>, vector<256x256xbf16>
    %c0_3 = arith.constant 0 : index
    %c0_4 = arith.constant 0 : index
    %2 = vector.load %arg3[%c0_3, %c0_4] : memref<1x256xf32, #tpu.memory_space<vmem>>, vector<1x256xf32>
    %c0_5 = arith.constant 0 : index
    %c0_6 = arith.constant 0 : index
    %3 = vector.load %arg5[%c0_5, %c0_6] : memref<1x256xf32, #tpu.memory_space<vmem>>, vector<1x256xf32>
    %c0_7 = arith.constant 0 : index
    %c0_8 = arith.constant 0 : index
    %4 = vector.load %arg6[%c0_7, %c0_8] : memref<16x8xbf16, #tpu.memory_space<vmem>>, vector<16x8xbf16>
    %c0_9 = arith.constant 0 : index
    %c0_10 = arith.constant 0 : index
    %5 = vector.load %arg7[%c0_9, %c0_10] : memref<16x8xbf16, #tpu.memory_space<vmem>>, vector<16x8xbf16>
    %c0_11 = arith.constant 0 : index
    %c0_12 = arith.constant 0 : index
    %6 = vector.load %arg8[%c0_11, %c0_12] : memref<16x8xbf16, #tpu.memory_space<vmem>>, vector<16x8xbf16>
    %c0_13 = arith.constant 0 : index
    %c0_14 = arith.constant 0 : index
    %7 = vector.load %arg9[%c0_13, %c0_14] : memref<16x1xf32, #tpu.memory_space<vmem>>, vector<16x1xf32>
    %cst = arith.constant 0.000000e+00 : f32
    %8 = vector.broadcast %cst : f32 to vector<8x256xf32>
    %c0_i32 = arith.constant 0 : i32
    %9 = arith.index_cast %c0_i32 : i32 to index
    %c0_15 = arith.constant 0 : index
    %c0_16 = arith.constant 0 : index
    %c0_17 = arith.constant 0 : index
    %10 = vector.load %arg1[%9, %c0_15, %c0_16, %c0_17] : memref<2x1x8x256xbf16, #tpu.memory_space<vmem>>, vector<1x1x8x256xbf16>
    %11 = vector.shape_cast %10 : vector<1x1x8x256xbf16> to vector<8x256xbf16>
    %cst_18 = arith.constant dense<0.000000e+00> : vector<8x256xf32>
    %12 = tpu.matmul %11, %0, %cst_18 {dimension_numbers = #tpu.dot_dimension_numbers<[1], [0], [0], [1], [0, 0, 1, 1], [], []>} : vector<8x256xbf16>, vector<256x256xbf16>, vector<8x256xf32> -> vector<8x256xf32>
    %13 = vector.broadcast %2 : vector<1x256xf32> to vector<8x256xf32>
    %14 = arith.addf %12, %13 : vector<8x256xf32>
    %15 = arith.subf %14, %8 : vector<8x256xf32>
    %cst_19 = arith.constant 5.000000e-01 : f32
    %16 = vector.broadcast %cst_19 : f32 to vector<8x256xf32>
    %17 = arith.mulf %15, %16 : vector<8x256xf32>
    %18 = arith.addf %8, %17 : vector<8x256xf32>
    %cst_20 = arith.constant 1.000000e+00 : f32
    %19 = vector.broadcast %cst_20 : f32 to vector<8x256xf32>
    %20 = arith.cmpf oge, %18, %19 : vector<8x256xf32>
    %cst_21 = arith.constant 0.000000e+00 : f32
    %21 = vector.broadcast %cst_21 : f32 to vector<8x256xf32>
    %22 = arith.select %20, %21, %18 : vector<8x256xi1>, vector<8x256xf32>
    %23 = arith.extui %20 : vector<8x256xi1> to vector<8x256xi32>
    %24 = arith.sitofp %23 : vector<8x256xi32> to vector<8x256xf32>
    %25 = arith.truncf %24 : vector<8x256xf32> to vector<8x256xbf16>
    %cst_22 = arith.constant dense<0.000000e+00> : vector<8x256xf32>
    %26 = tpu.matmul %11, %1, %cst_22 {dimension_numbers = #tpu.dot_dimension_numbers<[1], [0], [0], [1], [0, 0, 1, 1], [], []>} : vector<8x256xbf16>, vector<256x256xbf16>, vector<8x256xf32> -> vector<8x256xf32>
    %27 = vector.broadcast %3 : vector<1x256xf32> to vector<8x256xf32>
    %28 = arith.addf %26, %27 : vector<8x256xf32>
    %29 = arith.subf %28, %8 : vector<8x256xf32>
    %cst_23 = arith.constant 5.000000e-01 : f32
    %30 = vector.broadcast %cst_23 : f32 to vector<8x256xf32>
    %31 = arith.mulf %29, %30 : vector<8x256xf32>
    %32 = arith.addf %8, %31 : vector<8x256xf32>
    %cst_24 = arith.constant 1.000000e+00 : f32
    %33 = vector.broadcast %cst_24 : f32 to vector<8x256xf32>
    %34 = arith.cmpf oge, %32, %33 : vector<8x256xf32>
    %cst_25 = arith.constant 0.000000e+00 : f32
    %35 = vector.broadcast %cst_25 : f32 to vector<8x256xf32>
    %36 = arith.select %34, %35, %32 : vector<8x256xi1>, vector<8x256xf32>
    %37 = arith.extui %34 : vector<8x256xi1> to vector<8x256xi32>
    %38 = arith.sitofp %37 : vector<8x256xi32> to vector<8x256xf32>
    %39 = arith.truncf %38 : vector<8x256xf32> to vector<8x256xbf16>
    %cst_26 = arith.constant dense<0.000000e+00> : vector<16x256xf32>
    %40 = tpu.matmul %4, %11, %cst_26 {dimension_numbers = #tpu.dot_dimension_numbers<[1], [0], [0], [1], [0, 0, 1, 1], [], []>} : vector<16x8xbf16>, vector<8x256xbf16>, vector<16x256xf32> -> vector<16x256xf32>
    %cst_27 = arith.constant dense<0.000000e+00> : vector<16x256xf32>
    %41 = tpu.matmul %5, %25, %cst_27 {dimension_numbers = #tpu.dot_dimension_numbers<[1], [0], [0], [1], [0, 0, 1, 1], [], []>} : vector<16x8xbf16>, vector<8x256xbf16>, vector<16x256xf32> -> vector<16x256xf32>
    %42 = arith.addf %40, %41 : vector<16x256xf32>
    %cst_28 = arith.constant dense<0.000000e+00> : vector<16x256xf32>
    %43 = tpu.matmul %6, %39, %cst_28 {dimension_numbers = #tpu.dot_dimension_numbers<[1], [0], [0], [1], [0, 0, 1, 1], [], []>} : vector<16x8xbf16>, vector<8x256xbf16>, vector<16x256xf32> -> vector<16x256xf32>
    %44 = arith.addf %42, %43 : vector<16x256xf32>
    %45 = vector.broadcast %7 : vector<16x1xf32> to vector<16x256xf32>
    %46 = arith.addf %44, %45 : vector<16x256xf32>
    %47 = arith.index_cast %c0_i32 : i32 to index
    %c0_29 = arith.constant 0 : index
    %c0_30 = arith.constant 0 : index
    %c0_31 = arith.constant 0 : index
    %48 = vector.load %arg10[%47, %c0_29, %c0_30, %c0_31] : memref<2x1x16x256xf32, #tpu.memory_space<vmem>>, vector<1x1x16x256xf32>
    %49 = vector.shape_cast %48 : vector<1x1x16x256xf32> to vector<16x256xf32>
    %50 = vector.shape_cast %46 : vector<16x256xf32> to vector<1x1x16x256xf32>
    tpu.vector_store %arg10[%47, %c0_29, %c0_30, %c0_31], %50 {strides = array<i32>} : memref<2x1x16x256xf32, #tpu.memory_space<vmem>>, vector<1x1x16x256xf32>,
    %c1_i32 = arith.constant 1 : i32
    %51 = arith.index_cast %c1_i32 : i32 to index
    %c0_32 = arith.constant 0 : index
    %c0_33 = arith.constant 0 : index
    %c0_34 = arith.constant 0 : index
    %52 = vector.load %arg1[%51, %c0_32, %c0_33, %c0_34] : memref<2x1x8x256xbf16, #tpu.memory_space<vmem>>, vector<1x1x8x256xbf16>
    %53 = vector.shape_cast %52 : vector<1x1x8x256xbf16> to vector<8x256xbf16>
    %cst_35 = arith.constant dense<0.000000e+00> : vector<8x256xf32>
    %54 = tpu.matmul %53, %0, %cst_35 {dimension_numbers = #tpu.dot_dimension_numbers<[1], [0], [0], [1], [0, 0, 1, 1], [], []>} : vector<8x256xbf16>, vector<256x256xbf16>, vector<8x256xf32> -> vector<8x256xf32>
    %55 = vector.broadcast %2 : vector<1x256xf32> to vector<8x256xf32>
    %56 = arith.addf %54, %55 : vector<8x256xf32>
    %57 = arith.subf %56, %22 : vector<8x256xf32>
    %cst_36 = arith.constant 5.000000e-01 : f32
    %58 = vector.broadcast %cst_36 : f32 to vector<8x256xf32>
    %59 = arith.mulf %57, %58 : vector<8x256xf32>
    %60 = arith.addf %22, %59 : vector<8x256xf32>
    %cst_37 = arith.constant 1.000000e+00 : f32
    %61 = vector.broadcast %cst_37 : f32 to vector<8x256xf32>
    %62 = arith.cmpf oge, %60, %61 : vector<8x256xf32>
    %cst_38 = arith.constant 0.000000e+00 : f32
    %63 = vector.broadcast %cst_38 : f32 to vector<8x256xf32>
    %64 = arith.select %62, %63, %60 : vector<8x256xi1>, vector<8x256xf32>
    %65 = arith.extui %62 : vector<8x256xi1> to vector<8x256xi32>
    %66 = arith.sitofp %65 : vector<8x256xi32> to vector<8x256xf32>
    %67 = arith.truncf %66 : vector<8x256xf32> to vector<8x256xbf16>
    %cst_39 = arith.constant dense<0.000000e+00> : vector<8x256xf32>
    %68 = tpu.matmul %53, %1, %cst_39 {dimension_numbers = #tpu.dot_dimension_numbers<[1], [0], [0], [1], [0, 0, 1, 1], [], []>} : vector<8x256xbf16>, vector<256x256xbf16>, vector<8x256xf32> -> vector<8x256xf32>
    %69 = vector.broadcast %3 : vector<1x256xf32> to vector<8x256xf32>
    %70 = arith.addf %68, %69 : vector<8x256xf32>
    %71 = arith.subf %70, %36 : vector<8x256xf32>
    %cst_40 = arith.constant 5.000000e-01 : f32
    %72 = vector.broadcast %cst_40 : f32 to vector<8x256xf32>
    %73 = arith.mulf %71, %72 : vector<8x256xf32>
    %74 = arith.addf %36, %73 : vector<8x256xf32>
    %cst_41 = arith.constant 1.000000e+00 : f32
    %75 = vector.broadcast %cst_41 : f32 to vector<8x256xf32>
    %76 = arith.cmpf oge, %74, %75 : vector<8x256xf32>
    %cst_42 = arith.constant 0.000000e+00 : f32
    %77 = vector.broadcast %cst_42 : f32 to vector<8x256xf32>
    %78 = arith.select %76, %77, %74 : vector<8x256xi1>, vector<8x256xf32>
    %79 = arith.extui %76 : vector<8x256xi1> to vector<8x256xi32>
    %80 = arith.sitofp %79 : vector<8x256xi32> to vector<8x256xf32>
    %81 = arith.truncf %80 : vector<8x256xf32> to vector<8x256xbf16>
    %cst_43 = arith.constant dense<0.000000e+00> : vector<16x256xf32>
    %82 = tpu.matmul %4, %53, %cst_43 {dimension_numbers = #tpu.dot_dimension_numbers<[1], [0], [0], [1], [0, 0, 1, 1], [], []>} : vector<16x8xbf16>, vector<8x256xbf16>, vector<16x256xf32> -> vector<16x256xf32>
    %cst_44 = arith.constant dense<0.000000e+00> : vector<16x256xf32>
    %83 = tpu.matmul %5, %67, %cst_44 {dimension_numbers = #tpu.dot_dimension_numbers<[1], [0], [0], [1], [0, 0, 1, 1], [], []>} : vector<16x8xbf16>, vector<8x256xbf16>, vector<16x256xf32> -> vector<16x256xf32>
    %84 = arith.addf %82, %83 : vector<16x256xf32>
    %cst_45 = arith.constant dense<0.000000e+00> : vector<16x256xf32>
    %85 = tpu.matmul %6, %81, %cst_45 {dimension_numbers = #tpu.dot_dimension_numbers<[1], [0], [0], [1], [0, 0, 1, 1], [], []>} : vector<16x8xbf16>, vector<8x256xbf16>, vector<16x256xf32> -> vector<16x256xf32>
    %86 = arith.addf %84, %85 : vector<16x256xf32>
    %87 = vector.broadcast %7 : vector<16x1xf32> to vector<16x256xf32>
    %88 = arith.addf %86, %87 : vector<16x256xf32>
    %89 = arith.index_cast %c1_i32 : i32 to index
    %c0_46 = arith.constant 0 : index
    %c0_47 = arith.constant 0 : index
    %c0_48 = arith.constant 0 : index
    %90 = vector.load %arg10[%89, %c0_46, %c0_47, %c0_48] : memref<2x1x16x256xf32, #tpu.memory_space<vmem>>, vector<1x1x16x256xf32>
    %91 = vector.shape_cast %90 : vector<1x1x16x256xf32> to vector<16x256xf32>
    %92 = vector.shape_cast %88 : vector<16x256xf32> to vector<1x1x16x256xf32>
    tpu.vector_store %arg10[%89, %c0_46, %c0_47, %c0_48], %92 {strides = array<i32>} : memref<2x1x16x256xf32, #tpu.memory_space<vmem>>, vector<1x1x16x256xf32>,
    %c2_i32 = arith.constant 2 : i32
    return
  }
  func.func @transform_0(%arg0: i32) -> (i32, i32, i32, i32) {
    %c0_i32 = arith.constant 0 : i32
    %c0_i32_0 = arith.constant 0 : i32
    %c0_i32_1 = arith.constant 0 : i32
    %c0_i32_2 = arith.constant 0 : i32
    return %c0_i32, %arg0, %c0_i32_0, %c0_i32_1 : i32, i32, i32, i32
  }
  func.func @transform_1(%arg0: i32) -> (i32, i32) {
    %c0_i32 = arith.constant 0 : i32
    %c0_i32_0 = arith.constant 0 : i32
    %c0_i32_1 = arith.constant 0 : i32
    return %c0_i32, %c0_i32_0 : i32, i32
  }
  func.func @transform_2(%arg0: i32) -> (i32, i32) {
    %c0_i32 = arith.constant 0 : i32
    %c0_i32_0 = arith.constant 0 : i32
    %c0_i32_1 = arith.constant 0 : i32
    return %c0_i32, %c0_i32_0 : i32, i32
  }
  func.func @transform_3(%arg0: i32) -> (i32, i32) {
    %c0_i32 = arith.constant 0 : i32
    %c0_i32_0 = arith.constant 0 : i32
    %c0_i32_1 = arith.constant 0 : i32
    return %c0_i32, %c0_i32_0 : i32, i32
  }
  func.func @transform_4(%arg0: i32) -> (i32, i32) {
    %c0_i32 = arith.constant 0 : i32
    %c0_i32_0 = arith.constant 0 : i32
    %c0_i32_1 = arith.constant 0 : i32
    return %c0_i32, %c0_i32_0 : i32, i32
  }
  func.func @transform_5(%arg0: i32) -> (i32, i32) {
    %c0_i32 = arith.constant 0 : i32
    %c0_i32_0 = arith.constant 0 : i32
    %c0_i32_1 = arith.constant 0 : i32
    return %c0_i32, %c0_i32_0 : i32, i32
  }
  func.func @transform_6(%arg0: i32) -> (i32, i32) {
    %c0_i32 = arith.constant 0 : i32
    %c0_i32_0 = arith.constant 0 : i32
    %c0_i32_1 = arith.constant 0 : i32
    return %c0_i32, %c0_i32_0 : i32, i32
  }
  func.func @transform_7(%arg0: i32) -> (i32, i32) {
    %c0_i32 = arith.constant 0 : i32
    %c0_i32_0 = arith.constant 0 : i32
    %c0_i32_1 = arith.constant 0 : i32
    return %c0_i32, %c0_i32_0 : i32, i32
  }
  func.func @transform_8(%arg0: i32) -> (i32, i32) {
    %c0_i32 = arith.constant 0 : i32
    %c0_i32_0 = arith.constant 0 : i32
    %c0_i32_1 = arith.constant 0 : i32
    return %c0_i32, %c0_i32_0 : i32, i32
  }
  func.func @transform_9(%arg0: i32) -> (i32, i32, i32, i32) {
    %c0_i32 = arith.constant 0 : i32
    %c0_i32_0 = arith.constant 0 : i32
    %c0_i32_1 = arith.constant 0 : i32
    %c0_i32_2 = arith.constant 0 : i32
    return %c0_i32, %arg0, %c0_i32_0, %c0_i32_1 : i32, i32, i32, i32
  }
}

</mosaic_0001>

<bundles_post_ra>
// kernel: tpu_custom_call.1
= control target key start
LH: loop header
LB: loop body
LE: loop exit
PB: predicated region body
PF: predicated region fallthrough
CT: control target
= control target key end

     0   :  { %14 = vsyncpa [#allocation3], 0  ;;  %s2181_s0 = inlined_call_operand.hbm [shape: bf16[2,1,8,256], index: 0, kind: input, shape index: {}]   ;;  %s2182_s1 = inlined_call_operand.hbm [shape: bf16[256,256], index: 1, kind: input, shape index: {}]   ;;  %s2183_s2 = inlined_call_operand.hbm [shape: f32[1,256], index: 2, kind: input, shape index: {}]   ;;  %s2184_s3 = inlined_call_operand.hbm [shape: bf16[256,256], index: 3, kind: input, shape index: {}]   ;;  %s2185_s4 = inlined_call_operand.hbm [shape: f32[1,256], index: 4, kind: input, shape index: {}]   ;;  %s2186_s5 = inlined_call_operand.hbm [shape: bf16[16,8], index: 5, kind: input, shape index: {}]   ;;  %s2187_s6 = inlined_call_operand.hbm [shape: bf16[16,8], index: 6, kind: input, shape index: {}]   ;;  %s2188_s7 = inlined_call_operand.hbm [shape: bf16[16,8], index: 7, kind: input, shape index: {}]   ;;  %s2189_s8 = inlined_call_operand.hbm [shape: f32[16,1], index: 8, kind: input, shape index: {}]   ;;  %s2190_s9 = inlined_call_operand.hbm [shape: f32[2,1,16,256], index: 9, kind: output, shape index: {}]  }
   0x1   :  { %15 = vsyncpa [#allocation6], 0 }
   0x2   :  { %16 = vsyncpa [#allocation9], 0 }
   0x3   :  { %17 = vsyncpa [#allocation12], 0 }
   0x4   :  { %18 = vsyncpa [#allocation15], 0 }
   0x5   :  { %19 = vsyncpa [#allocation4], 0  ;;  %s1642_s30 = smov [#allocation5]   ;;  %s1643_s11 = smov [#allocation8]  }
   0x6   :  { %s37_s10 = sshll.u32 %s1642_s30, 4  ;;  %s59_s12 = sshll.u32 %s1643_s11, 4  ;;  %s38_s10 = int_to_ptr.vmem [resolvable:$true] %s37_s10  ;;  %s1710_s12 = int_to_ptr.vmem [resolvable:$true] %s59_s12 }
   0x7   :  { %s1410_s15 = scalar_lea.hbm %s2182_s1, 4096 }
   0x8   :  { %p1411_p0 = scmp.ne.s32.totalorder %s2182_s1, %s1410_s15  ;;  %p1414_p1 = scmp.lt.u32.totalorder %s1410_s15, %s2182_s1 }
   0xa   :  { %p1416_p2 = pnand %p1414_p1, %p1411_p0 }
   0xc   :  { %1419 = shalt.err (!%p1416_p2)
}
   0xd   :  { %s1420_s20 = scalar_lea.vmem %s38_s10, 4096  ;;  %p1425_p4 = scmp.lt.s32.totalorder %s38_s10, %s38_s10 }
   0xe   :  { %p1421_p3 = scmp.ne.s32.totalorder %s38_s10, %s1420_s20  ;;  %p1426_p5 = scmp.lt.s32.totalorder %s1420_s20, %s1420_s20 }
  0x10   :  { %p1427_p6 = por %p1426_p5, %p1425_p4 }
  0x12   :  { %p1428_p7 = pnand %p1427_p6, %p1421_p3 }
  0x14   :  { %1431 = shalt.err (!%p1428_p7)
}
  0x15   :  { %s1644_s21 = smov 128   ;;  %s1645_s22 = smov 8  }
  0x16   :  { %43 = dma.hbm_to_vmem [thread:$0]  %s2182_s1, 4096, %s38_s10, [#allocation6], %s1644_s21, %s1644_s21, %s1645_s22  }
  0x17   :  { %s1432_s27 = scalar_lea.hbm %s2184_s3, 4096 }
  0x18   :  { %p1433_p8 = scmp.ne.s32.totalorder %s2184_s3, %s1432_s27  ;;  %p1436_p9 = scmp.lt.u32.totalorder %s1432_s27, %s2184_s3 }
  0x1a   :  { %p1438_p10 = pnand %p1436_p9, %p1433_p8 }
  0x1c   :  { %1441 = shalt.err (!%p1438_p10)
}
  0x1d   :  { %s1442_s13 = scalar_lea.vmem %s1710_s12, 4096  ;;  %p1447_p12 = scmp.lt.s32.totalorder %s1710_s12, %s1710_s12 }
  0x1e   :  { %p1443_p11 = scmp.ne.s32.totalorder %s1710_s12, %s1442_s13  ;;  %p1448_p13 = scmp.lt.s32.totalorder %s1442_s13, %s1442_s13 }
  0x20   :  { %p1449_p0 = por %p1448_p13, %p1447_p12 }
  0x22   :  { %p1450_p1 = pnand %p1449_p0, %p1443_p11 }
  0x24   :  { %1453 = shalt.err (!%p1450_p1)
}
  0x25   :  { %65 = dma.hbm_to_vmem [thread:$0]  %s2184_s3, 4096, %s1710_s12, [#allocation9], %s1644_s21, %s1644_s21, %s1645_s22  }
  0x26   :  { %s1646_s14 = smov [#allocation11]   ;;  %s1454_s18 = scalar_lea.hbm %s2186_s5, 128 }
  0x27   :  { %s81_s15 = sshll.u32 %s1646_s14, 4  ;;  %p1455_p2 = scmp.ne.s32.totalorder %s2186_s5, %s1454_s18  ;;  %s82_s15 = int_to_ptr.vmem [resolvable:$true] %s81_s15 }
  0x28   :  { %p1458_p3 = scmp.lt.u32.totalorder %s1454_s18, %s2186_s5 }
  0x2a   :  { %p1460_p4 = pnand %p1458_p3, %p1455_p2 }
  0x2c   :  { %1463 = shalt.err (!%p1460_p4)
}
  0x2d   :  { %s1464_s25 = scalar_lea.vmem %s82_s15, 128  ;;  %p1469_p6 = scmp.lt.s32.totalorder %s82_s15, %s82_s15 }
  0x2e   :  { %p1465_p5 = scmp.ne.s32.totalorder %s82_s15, %s1464_s25  ;;  %p1470_p7 = scmp.lt.s32.totalorder %s1464_s25, %s1464_s25 }
  0x30   :  { %p1471_p8 = por %p1470_p7, %p1469_p6 }
  0x32   :  { %p1472_p9 = pnand %p1471_p8, %p1465_p5 }
  0x34   :  { %1475 = shalt.err (!%p1472_p9)
}
  0x35   :  { %s1647_s3 = smov 64   ;;  %s1648_s12 = smov 4  }
  0x36   :  { %87 = dma.hbm_to_vmem [thread:$0]  %s2186_s5, 128, %s82_s15, [#allocation12], %s1647_s3, %s1647_s3, %s1648_s12  }
  0x37   :  { %s1649_s28 = smov [#allocation14]   ;;  %s1650_s30 = smov [#allocation2]  }
  0x38   :  { %s105_s29 = sshll.u32 %s1649_s28, 4  ;;  %s25_s11 = sshll.u32 %s1650_s30, 4  ;;  %s106_s29 = int_to_ptr.vmem [resolvable:$true] %s105_s29  ;;  %s26_s11 = int_to_ptr.vmem [resolvable:$true] %s25_s11 }
  0x39   :  { %s1476_s10 = scalar_lea.hbm %s2188_s7, 128 }
  0x3a   :  { %p1477_p10 = scmp.ne.s32.totalorder %s2188_s7, %s1476_s10  ;;  %p1480_p11 = scmp.lt.u32.totalorder %s1476_s10, %s2188_s7 }
  0x3c   :  { %p1482_p12 = pnand %p1480_p11, %p1477_p10 }
  0x3e   :  { %1485 = shalt.err (!%p1482_p12)
}
  0x3f   :  { %s1486_s5 = scalar_lea.vmem %s106_s29, 128  ;;  %p1491_p0 = scmp.lt.s32.totalorder %s106_s29, %s106_s29 }
  0x40   :  { %p1487_p13 = scmp.ne.s32.totalorder %s106_s29, %s1486_s5  ;;  %p1492_p1 = scmp.lt.s32.totalorder %s1486_s5, %s1486_s5 }
  0x42   :  { %p1493_p2 = por %p1492_p1, %p1491_p0 }
  0x44   :  { %p1494_p3 = pnand %p1493_p2, %p1487_p13 }
  0x46   :  { %1497 = shalt.err (!%p1494_p3)
}
  0x47   :  { %111 = dma.hbm_to_vmem [thread:$0]  %s2188_s7, 128, %s106_s29, [#allocation15], %s1647_s3, %s1647_s3, %s1648_s12  }
  0x48   :  { %s1498_s24 = scalar_lea.hbm %s2181_s0, 256 }
  0x49   :  { %p1499_p4 = scmp.ne.s32.totalorder %s2181_s0, %s1498_s24  ;;  %p1502_p5 = scmp.lt.u32.totalorder %s1498_s24, %s2181_s0 }
  0x4b   :  { %p1504_p6 = pnand %p1502_p5, %p1499_p4 }
  0x4d   :  { %1507 = shalt.err (!%p1504_p6)
}
  0x4e   :  { %s1508_s30 = scalar_lea.vmem %s26_s11, 256  ;;  %p1513_p8 = scmp.lt.s32.totalorder %s26_s11, %s26_s11 }
  0x4f   :  { %p1509_p7 = scmp.ne.s32.totalorder %s26_s11, %s1508_s30  ;;  %p1514_p9 = scmp.lt.s32.totalorder %s1508_s30, %s1508_s30 }
  0x51   :  { %p1515_p10 = por %p1514_p9, %p1513_p8 }
  0x53   :  { %p1516_p11 = pnand %p1515_p10, %p1509_p7 }
  0x55   :  { %1519 = shalt.err (!%p1516_p11)
}
  0x56   :  { %31 = dma.hbm_to_vmem [thread:$0]  %s2181_s0, 256, %s26_s11, [#allocation3], %s1644_s21, %s1644_s21, %s1645_s22  }
  0x57   :  { %s1651_s13 = smov [#allocation7]   ;;  %s1652_s10 = smov [#allocation10]  }
  0x58   :  { %s50_s1 = sshll.u32 %s1651_s13, 4  ;;  %s72_s14 = sshll.u32 %s1652_s10, 4  ;;  %s51_s1 = int_to_ptr.vmem [resolvable:$true] %s50_s1  ;;  %s73_s14 = int_to_ptr.vmem [resolvable:$true] %s72_s14 }
  0x59   :  { %s1520_s18 = scalar_lea.hbm %s2183_s2, 32 }
  0x5a   :  { %p1521_p12 = scmp.ne.s32.totalorder %s2183_s2, %s1520_s18  ;;  %p1524_p13 = scmp.lt.u32.totalorder %s1520_s18, %s2183_s2 }
  0x5c   :  { %p1526_p0 = pnand %p1524_p13, %p1521_p12 }
  0x5e   :  { %1529 = shalt.err (!%p1526_p0)
}
  0x5f   :  { %s1530_s0 = scalar_lea.vmem %s51_s1, 32  ;;  %p1535_p2 = scmp.lt.s32.totalorder %s51_s1, %s51_s1 }
  0x60   :  { %p1531_p1 = scmp.ne.s32.totalorder %s51_s1, %s1530_s0  ;;  %p1536_p3 = scmp.lt.s32.totalorder %s1530_s0, %s1530_s0 }
  0x62   :  { %p1537_p4 = por %p1536_p3, %p1535_p2 }
  0x64   :  { %p1538_p5 = pnand %p1537_p4, %p1531_p1 }
  0x66   :  { %1541 = shalt.err (!%p1538_p5)
}
  0x67   :  { %53 = dma.hbm_to_vmem [thread:$0]  %s2183_s2, 32, %s51_s1, [#allocation6]  }
  0x68   :  { %s1542_s26 = scalar_lea.hbm %s2185_s4, 32 }
  0x69   :  { %p1543_p6 = scmp.ne.s32.totalorder %s2185_s4, %s1542_s26  ;;  %p1546_p7 = scmp.lt.u32.totalorder %s1542_s26, %s2185_s4 }
  0x6b   :  { %p1548_p8 = pnand %p1546_p7, %p1543_p6 }
  0x6d   :  { %1551 = shalt.err (!%p1548_p8)
}
  0x6e   :  { %s1552_s29 = scalar_lea.vmem %s73_s14, 32  ;;  %p1557_p10 = scmp.lt.s32.totalorder %s73_s14, %s73_s14 }
  0x6f   :  { %p1553_p9 = scmp.ne.s32.totalorder %s73_s14, %s1552_s29  ;;  %p1558_p11 = scmp.lt.s32.totalorder %s1552_s29, %s1552_s29 }
  0x71   :  { %p1559_p12 = por %p1558_p11, %p1557_p10 }
  0x73   :  { %p1560_p13 = pnand %p1559_p12, %p1553_p9 }
  0x75   :  { %1563 = shalt.err (!%p1560_p13)
}
  0x76   :  { %75 = dma.hbm_to_vmem [thread:$0]  %s2185_s4, 32, %s73_s14, [#allocation9]  }
  0x77   :  { %s1653_s1 = smov [#allocation13]   ;;  %s1654_s16 = smov [#allocation16]  }
  0x78   :  { %s93_s10 = sshll.u32 %s1653_s1, 4  ;;  %s117_s17 = sshll.u32 %s1654_s16, 4  ;;  %s94_s10 = int_to_ptr.vmem [resolvable:$true] %s93_s10  ;;  %s118_s17 = int_to_ptr.vmem [resolvable:$true] %s117_s17 }
  0x79   :  { %s1564_s15 = scalar_lea.hbm %s2187_s6, 128 }
  0x7a   :  { %p1565_p0 = scmp.ne.s32.totalorder %s2187_s6, %s1564_s15  ;;  %p1568_p1 = scmp.lt.u32.totalorder %s1564_s15, %s2187_s6 }
  0x7c   :  { %p1570_p2 = pnand %p1568_p1, %p1565_p0 }
  0x7e   :  { %1573 = shalt.err (!%p1570_p2)
}
  0x7f   :  { %s1574_s4 = scalar_lea.vmem %s94_s10, 128  ;;  %p1579_p4 = scmp.lt.s32.totalorder %s94_s10, %s94_s10 }
  0x80   :  { %p1575_p3 = scmp.ne.s32.totalorder %s94_s10, %s1574_s4  ;;  %p1580_p5 = scmp.lt.s32.totalorder %s1574_s4, %s1574_s4 }
  0x82   :  { %p1581_p6 = por %p1580_p5, %p1579_p4 }
  0x84   :  { %p1582_p7 = pnand %p1581_p6, %p1575_p3 }
  0x86   :  { %1585 = shalt.err (!%p1582_p7)
}
  0x87   :  { %99 = dma.hbm_to_vmem [thread:$0]  %s2187_s6, 128, %s94_s10, [#allocation12], %s1647_s3, %s1647_s3, %s1648_s12  }
  0x88   :  { %s1586_s26 = scalar_lea.hbm %s2189_s8, 256 }
  0x89   :  { %p1587_p8 = scmp.ne.s32.totalorder %s2189_s8, %s1586_s26  ;;  %p1590_p9 = scmp.lt.u32.totalorder %s1586_s26, %s2189_s8 }
  0x8b   :  { %p1592_p10 = pnand %p1590_p9, %p1587_p8 }
  0x8d   :  { %1595 = shalt.err (!%p1592_p10)
}
  0x8e   :  { %s1596_s29 = scalar_lea.vmem %s118_s17, 256  ;;  %p1601_p12 = scmp.lt.s32.totalorder %s118_s17, %s118_s17 }
  0x8f   :  { %p1597_p11 = scmp.ne.s32.totalorder %s118_s17, %s1596_s29  ;;  %p1602_p13 = scmp.lt.s32.totalorder %s1596_s29, %s1596_s29 }
  0x91   :  { %p1603_p0 = por %p1602_p13, %p1601_p12 }
  0x93   :  { %p1604_p1 = pnand %p1603_p0, %p1597_p11 }
  0x95   :  { %1607 = shalt.err (!%p1604_p1)
}
  0x96   :  { %123 = dma.hbm_to_vmem [thread:$0]  %s2189_s8, 256, %s118_s17, [#allocation15], %s1644_s21, %s1644_s21, %s1645_s22  }
  0x97   :  { %1630 = dma.done.wait [#allocation3], 256  }
  0x98   :  { %1631 = vsyncadd [#allocation3], 4294967040 }
  0x99   :  { %1632 = dma.done.wait [#allocation6], 4128  }
  0x9a   :  { %1633 = vsyncadd [#allocation6], 4294963168 }
  0x9b   :  { %1634 = dma.done.wait [#allocation9], 4128  }
  0x9c   :  { %1635 = vsyncadd [#allocation9], 4294963168 }
  0x9d   :  { %1636 = dma.done.wait [#allocation12], 256  }
  0x9e   :  { %1637 = vsyncadd [#allocation12], 4294967040 }
  0x9f   :  { %1638 = dma.done.wait [#allocation15], 384  }
  0xa0   :  { %1639 = vsyncadd [#allocation15], 4294966912  ;;  %v1846_v0 = vld [vmem:[#allocation5 + $0x4] ss:$8 sps:$4 sm:$0xff]   ;;  %v1851_v2 = vld [vmem:[#allocation5] ss:$8 sps:$4 sm:$0xff]  }
  0xa1   :  { %v1848_v1 = vld [vmem:[#allocation8 + $0x4] ss:$8 sps:$4 sm:$0xff]   ;;  %405 = vmatprep.subr.bf16.mxu0 %v1846_v0  ;;  %v1853_v3 = vld [vmem:[#allocation8] ss:$8 sps:$4 sm:$0xff]   ;;  %v1856_v4 = vld [vmem:[#allocation5 + $0x14] ss:$8 sps:$4 sm:$0xff]  }
  0xa2   :  { %631 = vmatprep.subr.bf16.mxu1 %v1848_v1  ;;  %406 = vmatpush1.bf16.msra.mxu0 %v1851_v2  ;;  %v1860_v5 = vld [vmem:[#allocation8 + $0x14] ss:$8 sps:$4 sm:$0xff]   ;;  %v1865_v7 = vld [vmem:[#allocation8 + $0x10] ss:$8 sps:$4 sm:$0xff]   ;;  %v1868_v8 = vld [vmem:[#allocation5 + $0x24] ss:$8 sps:$4 sm:$0xff]  }
  0xa3   :  { %632 = vmatpush1.bf16.msra.mxu1 %v1853_v3  ;;  %v1862_v6 = vld [vmem:[#allocation5 + $0x10] ss:$8 sps:$4 sm:$0xff]   ;;  %407 = vmatprep.subr.bf16.mxu0 %v1856_v4  ;;  %v1872_v10 = vld [vmem:[#allocation5 + $0x20] ss:$8 sps:$4 sm:$0xff]   ;;  %v1878_v12 = vld [vmem:[#allocation5 + $0x34] ss:$8 sps:$4 sm:$0xff]  }
  0xa4   :  { %633 = vmatprep.subr.bf16.mxu1 %v1860_v5  ;;  %v1870_v9 = vld [vmem:[#allocation8 + $0x24] ss:$8 sps:$4 sm:$0xff]   ;;  %v1874_v11 = vld [vmem:[#allocation8 + $0x20] ss:$8 sps:$4 sm:$0xff]   ;;  %v1882_v13 = vld [vmem:[#allocation8 + $0x34] ss:$8 sps:$4 sm:$0xff]  }
  0xa5   :  { %v1884_v14 = vld [vmem:[#allocation5 + $0x30] ss:$8 sps:$4 sm:$0xff]   ;;  %v1890_v16 = vld [vmem:[#allocation5 + $0x44] ss:$8 sps:$4 sm:$0xff]   ;;  %v1896_v18 = vld [vmem:[#allocation5 + $0x40] ss:$8 sps:$4 sm:$0xff]  }
  0xa6   :  { %408 = vmatpush1.bf16.msra.mxu0 %v1862_v6  ;;  %v1888_v15 = vld [vmem:[#allocation8 + $0x30] ss:$8 sps:$4 sm:$0xff]   ;;  %v1894_v17 = vld [vmem:[#allocation8 + $0x44] ss:$8 sps:$4 sm:$0xff]   ;;  %v1898_v19 = vld [vmem:[#allocation8 + $0x40] ss:$8 sps:$4 sm:$0xff]  }
  0xa7   :  { %634 = vmatpush1.bf16.msra.mxu1 %v1865_v7  ;;  %409 = vmatprep.subr.bf16.mxu0 %v1868_v8  ;;  %v1902_v20 = vld [vmem:[#allocation5 + $0x54] ss:$8 sps:$4 sm:$0xff]   ;;  %v1908_v22 = vld [vmem:[#allocation5 + $0x50] ss:$8 sps:$4 sm:$0xff]   ;;  %v1914_v24 = vld [vmem:[#allocation5 + $0x64] ss:$8 sps:$4 sm:$0xff]  }
  0xa8   :  { %635 = vmatprep.subr.bf16.mxu1 %v1870_v9  ;;  %v1906_v21 = vld [vmem:[#allocation8 + $0x54] ss:$8 sps:$4 sm:$0xff]   ;;  %v1912_v23 = vld [vmem:[#allocation8 + $0x50] ss:$8 sps:$4 sm:$0xff]   ;;  %v1918_v25 = vld [vmem:[#allocation8 + $0x64] ss:$8 sps:$4 sm:$0xff]  }
  0xa9   :  { %v1920_v26 = vld [vmem:[#allocation5 + $0x60] ss:$8 sps:$4 sm:$0xff]   ;;  %v1926_v28 = vld [vmem:[#allocation5 + $0x74] ss:$8 sps:$4 sm:$0xff]   ;;  %v1932_v30 = vld [vmem:[#allocation5 + $0x70] ss:$8 sps:$4 sm:$0xff]  }
  0xaa   :  { %410 = vmatpush1.bf16.msra.mxu0 %v1872_v10  ;;  %v1922_v27 = vld [vmem:[#allocation8 + $0x60] ss:$8 sps:$4 sm:$0xff]   ;;  %v1930_v29 = vld [vmem:[#allocation8 + $0x74] ss:$8 sps:$4 sm:$0xff]   ;;  %v1936_v31 = vld [vmem:[#allocation8 + $0x70] ss:$8 sps:$4 sm:$0xff]  }
  0xab   :  { %636 = vmatpush1.bf16.msra.mxu1 %v1874_v11  ;;  %411 = vmatprep.subr.bf16.mxu0 %v1878_v12  ;;  %v1938_v32 = vld [vmem:[#allocation5 + $0x84] ss:$8 sps:$4 sm:$0xff]   ;;  %v1944_v34 = vld [vmem:[#allocation5 + $0x80] ss:$8 sps:$4 sm:$0xff]   ;;  %v1950_v36 = vld [vmem:[#allocation5 + $0x94] ss:$8 sps:$4 sm:$0xff]  }
  0xac   :  { %637 = vmatprep.subr.bf16.mxu1 %v1882_v13  ;;  %v1942_v33 = vld [vmem:[#allocation8 + $0x84] ss:$8 sps:$4 sm:$0xff]   ;;  %v1946_v35 = vld [vmem:[#allocation8 + $0x80] ss:$8 sps:$4 sm:$0xff]   ;;  %v1954_v37 = vld [vmem:[#allocation8 + $0x94] ss:$8 sps:$4 sm:$0xff]  }
  0xad   :  { %v1956_v38 = vld [vmem:[#allocation5 + $0x90] ss:$8 sps:$4 sm:$0xff]   ;;  %v1962_v40 = vld [vmem:[#allocation5 + $0xa4] ss:$8 sps:$4 sm:$0xff]   ;;  %v1968_v42 = vld [vmem:[#allocation5 + $0xa0] ss:$8 sps:$4 sm:$0xff]  }
  0xae   :  { %412 = vmatpush1.bf16.msra.mxu0 %v1884_v14  ;;  %v1960_v39 = vld [vmem:[#allocation8 + $0x90] ss:$8 sps:$4 sm:$0xff]   ;;  %v1966_v41 = vld [vmem:[#allocation8 + $0xa4] ss:$8 sps:$4 sm:$0xff]   ;;  %v1970_v43 = vld [vmem:[#allocation8 + $0xa0] ss:$8 sps:$4 sm:$0xff]  }
  0xaf   :  { %638 = vmatpush1.bf16.msra.mxu1 %v1888_v15  ;;  %413 = vmatprep.subr.bf16.mxu0 %v1890_v16  ;;  %v1974_v44 = vld [vmem:[#allocation5 + $0xb4] ss:$8 sps:$4 sm:$0xff]   ;;  %v1980_v46 = vld [vmem:[#allocation5 + $0xb0] ss:$8 sps:$4 sm:$0xff]   ;;  %v1984_v49 = vld [vmem:[#allocation5 + $0xc4] ss:$8 sps:$4 sm:$0xff]  }
  0xb0   :  { %639 = vmatprep.subr.bf16.mxu1 %v1894_v17  ;;  %v1978_v45 = vld [vmem:[#allocation8 + $0xb4] ss:$8 sps:$4 sm:$0xff]   ;;  %v1982_v48 = vld [vmem:[#allocation8 + $0xb0] ss:$8 sps:$4 sm:$0xff]   ;;  %v1992_v51 = vld [vmem:[#allocation8 + $0xc4] ss:$8 sps:$4 sm:$0xff]  }
  0xb1   :  { %v226_v47 = vld [vmem:[#allocation2] sm:$0xff]  ;;  %2196 = vst [vmem:[#allocation24_spill] sm:$0xff] %v1982_v48  ;;  %2197 = vst [vmem:[#allocation25_spill] sm:$0xff] %v1992_v51  ;;  %v1383_v52 = vld [vmem:[#allocation5 + $0xc0] ss:$8 sps:$4 sm:$0xff]   ;;  %vm695_vm3 = vcmask 1043456  }
  0xb2   :  { %414 = vmatpush1.bf16.msra.mxu0 %v1896_v18  ;;  %v1986_v50 = vcombine.high %v226_v47, %v226_v47  ;;  %v1998_v53 = vld [vmem:[#allocation8 + $0xc0] ss:$8 sps:$4 sm:$0xff]   ;;  %v1385_v54 = vld [vmem:[#allocation5 + $0xd4] ss:$8 sps:$4 sm:$0xff]   ;;  %v1389_v56 = vld [vmem:[#allocation5 + $0xd0] ss:$8 sps:$4 sm:$0xff]  }
  0xb3   :  { %640 = vmatpush1.bf16.msra.mxu1 %v1898_v19  ;;  %415 = vmatprep.subr.bf16.mxu0 %v1902_v20  ;;  %2198 = vst [vmem:[#allocation26_spill] sm:$0xff] %v1998_v53  ;;  %v2002_v55 = vld [vmem:[#allocation8 + $0xd4] ss:$8 sps:$4 sm:$0xff]   ;;  %v2005_v57 = vld [vmem:[#allocation8 + $0xd0] ss:$8 sps:$4 sm:$0xff]   ;;  %vm691_vm5 = vcmask 64512  }
  0xb4   :  { %641 = vmatprep.subr.bf16.mxu1 %v1906_v21  ;;  %437 = vmatprep.mubr.bf16.mxu0 %v1986_v50  ;;  %2199 = vst [vmem:[#allocation27_spill] sm:$0xff] %v2002_v55  ;;  %2200 = vst [vmem:[#allocation28_spill] sm:$0xff] %v2005_v57  ;;  %v1391_v58 = vld [vmem:[#allocation5 + $0xe4] ss:$8 sps:$4 sm:$0xff]   ;;  %v1395_v60 = vld [vmem:[#allocation5 + $0xe0] ss:$8 sps:$4 sm:$0xff]  }
  0xb5   :  { %663 = vmatprep.mubr.bf16.mxu1 %v1986_v50  ;;  %v2008_v59 = vld [vmem:[#allocation8 + $0xe4] ss:$8 sps:$4 sm:$0xff]   ;;  %v2011_v61 = vld [vmem:[#allocation8 + $0xe0] ss:$8 sps:$4 sm:$0xff]   ;;  %v1397_v62 = vld [vmem:[#allocation5 + $0xf4] ss:$8 sps:$4 sm:$0xff]  }
  0xb6   :  { %416 = vmatpush1.bf16.msra.mxu0 %v1908_v22  ;;  %v2014_v63 = vld [vmem:[#allocation8 + $0xf4] ss:$8 sps:$4 sm:$0xff]   ;;  %s1657_s8 = smov [#allocation17]  }
  0xb7   :  { %642 = vmatpush1.bf16.msra.mxu1 %v1912_v23  ;;  %417 = vmatprep.subr.bf16.mxu0 %v1914_v24  ;;  %s1165_s21 = sshll.u32 %s1657_s8, 4  ;;  %s1166_s21 = int_to_ptr.vmem [resolvable:$true] %s1165_s21 }
  0xb8   :  { %643 = vmatprep.subr.bf16.mxu1 %v1918_v25  ;;  %s1608_s22 = scalar_lea.vmem %s1166_s21, 1024  ;;  %p1613_p3 = scmp.lt.s32.totalorder %s1166_s21, %s1166_s21 }
  0xb9   :  { %p1609_p2 = scmp.ne.s32.totalorder %s1166_s21, %s1608_s22  ;;  %p1614_p4 = scmp.lt.s32.totalorder %s1608_s22, %s1608_s22 }
  0xba   :  { %418 = vmatpush1.bf16.msra.mxu0 %v1920_v26 }
  0xbb   :  { %644 = vmatpush1.bf16.msra.mxu1 %v1922_v27  ;;  %419 = vmatprep.subr.bf16.mxu0 %v1926_v28  ;;  %p1615_p5 = por %p1614_p4, %p1613_p3 }
  0xbc   :  { %645 = vmatprep.subr.bf16.mxu1 %v1930_v29 }
  0xbd   :  { %p1616_p6 = pnand %p1615_p5, %p1609_p2 }
  0xbe   :  { %420 = vmatpush1.bf16.msra.mxu0 %v1932_v30 }
  0xbf   :  { %646 = vmatpush1.bf16.msra.mxu1 %v1936_v31  ;;  %421 = vmatprep.subr.bf16.mxu0 %v1938_v32 }
  0xc0   :  { %647 = vmatprep.subr.bf16.mxu1 %v1942_v33 }
  0xc2   :  { %422 = vmatpush1.bf16.msra.mxu0 %v1944_v34 }
  0xc3   :  { %648 = vmatpush1.bf16.msra.mxu1 %v1946_v35  ;;  %423 = vmatprep.subr.bf16.mxu0 %v1950_v36 }
  0xc4   :  { %649 = vmatprep.subr.bf16.mxu1 %v1954_v37 }
  0xc6   :  { %424 = vmatpush1.bf16.msra.mxu0 %v1956_v38 }
  0xc7   :  { %650 = vmatpush1.bf16.msra.mxu1 %v1960_v39  ;;  %425 = vmatprep.subr.bf16.mxu0 %v1962_v40 }
  0xc8   :  { %651 = vmatprep.subr.bf16.mxu1 %v1966_v41 }
  0xca   :  { %426 = vmatpush1.bf16.msra.mxu0 %v1968_v42 }
  0xcb   :  { %652 = vmatpush1.bf16.msra.mxu1 %v1970_v43  ;;  %427 = vmatprep.subr.bf16.mxu0 %v1974_v44 }
  0xcc   :  { %653 = vmatprep.subr.bf16.mxu1 %v1978_v45 }
  0xce   :  { %428 = vmatpush1.bf16.msra.mxu0 %v1980_v46 }
  0xcf   :  { %654 = vmatpush1.bf16.msra.mxu1 %v1982_v48  ;;  %429 = vmatprep.subr.bf16.mxu0 %v1984_v49 }
  0xd0   :  { %655 = vmatprep.subr.bf16.mxu1 %v1992_v51  ;;  %v882_v51 = vld [vmem:[#allocation2 + $0x8] sm:$0xff] }
  0xd1   :  { %v2023_v48 = vcombine.high %v882_v51, %v882_v51 }
  0xd2   :  { %430 = vmatpush1.bf16.msra.mxu0 %v1383_v52 }
  0xd3   :  { %656 = vmatpush1.bf16.msra.mxu1 %v1998_v53  ;;  %431 = vmatprep.subr.bf16.mxu0 %v1385_v54  ;;  %v1401_v53 = vld [vmem:[#allocation5 + $0xf0] ss:$8 sps:$4 sm:$0xff]  }
  0xd4   :  { %657 = vmatprep.subr.bf16.mxu1 %v2002_v55  ;;  %v2017_v55 = vld [vmem:[#allocation8 + $0xf0] ss:$8 sps:$4 sm:$0xff]  }
  0xd6   :  { %432 = vmatpush1.bf16.msra.mxu0 %v1389_v56 }
  0xd7   :  { %658 = vmatpush1.bf16.msra.mxu1 %v2005_v57  ;;  %433 = vmatprep.subr.bf16.mxu0 %v1391_v58  ;;  %v2020_v57 = vcombine.low %v226_v47, %v226_v47 }
  0xd8   :  { %659 = vmatprep.subr.bf16.mxu1 %v2008_v59 }
  0xda   :  { %434 = vmatpush1.bf16.msra.mxu0 %v1395_v60 }
  0xdb   :  { %660 = vmatpush1.bf16.msra.mxu1 %v2011_v61  ;;  %435 = vmatprep.subr.bf16.mxu0 %v1397_v62 }
  0xdc   :  { %661 = vmatprep.subr.bf16.mxu1 %v2014_v63 }
  0xde   :  { %436 = vmatpush1.bf16.msra.mxu0 %v1401_v53 }
  0xdf   :  { %662 = vmatpush1.bf16.msra.mxu1 %v2017_v55 }
  0xe0   :  { %890 = vmatprep.subr.bf16.mxu1 %v1846_v0  ;;  %v2053_v0 = vcombine.low %v882_v51, %v882_v51 }
  0xe1   :  { %438 = vmatmul.mubr.bf16.vlgmr.msra.gmra.mrb[0].mxu0 %v2020_v57 }
  0xe2   :  { %664 = vmatmul.mubr.bf16.vlgmr.msra.gmra.mrb[0].mxu1 %v2020_v57 }
  0xe3   :  { %891 = vmatpush1.bf16.msra.mxu1 %v1851_v2  ;;  %922 = vmatprep.mubr.bf16.mxu1 %v2023_v48  ;;  %v1655_v2 = vmov 0  }
  0xe4   :  { %892 = vmatprep.subr.bf16.mxu1 %v1856_v4  ;;  %734 = vmatprep.mubr.bf16.mxu0 %v1655_v2  ;;  %v224_v4 = vld [vmem:[#allocation16] sm:$0xff] }
  0xe5   :  { %1306 = vset.pattern.permute.xlu0 %v1655_v2 }
  0xe6   :  { %865 = vperm.xlu0 %1306, %v224_v4  }
  0xe7   :  { %893 = vmatpush1.bf16.msra.mxu1 %v1862_v6  ;;  %v225_v6 = vld [vmem:[#allocation16 + $0x8] sm:$0xff] }
  0xe8   :  { %894 = vmatprep.subr.bf16.mxu1 %v1868_v8  ;;  %v228_v8 = vlaneseq }
  0xea   :  { %870 = vperm.xlu0 %1306, %v225_v6  }
  0xeb   :  { %895 = vmatpush1.bf16.msra.mxu1 %v1872_v10  ;;  %v229_v10 = vshrl.u32 %v228_v8, 7 }
  0xec   :  { %896 = vmatprep.subr.bf16.mxu1 %v1878_v12 }
  0xed   :  { %v230_v12 = vsub.s32 0, %v229_v10 }
  0xef   :  { %897 = vmatpush1.bf16.msra.mxu1 %v1884_v14  ;;  %v216_v14 = vld [vmem:[#allocation7] sm:$0x3] }
  0xf0   :  { %898 = vmatprep.subr.bf16.mxu1 %v1890_v16  ;;  %v234_v16 = vsub.s32 1, %v229_v10 }
  0xf3   :  { %899 = vmatpush1.bf16.msra.mxu1 %v1896_v18  ;;  %v217_v18 = vld [vmem:[#allocation10] sm:$0x3] }
  0xf4   :  { %900 = vmatprep.subr.bf16.mxu1 %v1902_v20  ;;  %v2059_v20 = vrot.slane %v216_v14, %v230_v12 }
  0xf7   :  { %901 = vmatpush1.bf16.msra.mxu1 %v1908_v22  ;;  %v2061_v22 = vrot.slane %v217_v18, %v230_v12 }
  0xf8   :  { %902 = vmatprep.subr.bf16.mxu1 %v1914_v24  ;;  %v2063_v24 = vrot.slane %v216_v14, %v234_v16  ;;  %v2083_v14 = vld [vmem:[#allocation13] sm:$0xff]  }
  0xfb   :  { %903 = vmatpush1.bf16.msra.mxu1 %v1920_v26  ;;  %v2065_v26 = vrot.slane %v217_v18, %v234_v16  ;;  %v754_v18 = vsel %vm695_vm3, %v2020_v57, 0 }
  0xfc   :  { %904 = vmatprep.subr.bf16.mxu1 %v1926_v28 }
  0xff   :  { %905 = vmatpush1.bf16.msra.mxu1 %v1932_v30 }
 0x100   :  { %906 = vmatprep.subr.bf16.mxu1 %v1938_v32 }
 0x103   :  { %907 = vmatpush1.bf16.msra.mxu1 %v1944_v34 }
 0x104   :  { %908 = vmatprep.subr.bf16.mxu1 %v1950_v36 }
 0x107   :  { %909 = vmatpush1.bf16.msra.mxu1 %v1956_v38 }
 0x108   :  { %910 = vmatprep.subr.bf16.mxu1 %v1962_v40 }
 0x10b   :  { %911 = vmatpush1.bf16.msra.mxu1 %v1968_v42 }
 0x10c   :  { %912 = vmatprep.subr.bf16.mxu1 %v1974_v44 }
 0x10f   :  { %913 = vmatpush1.bf16.msra.mxu1 %v1980_v46 }
 0x110   :  { %914 = vmatprep.subr.bf16.mxu1 %v1984_v49 }
 0x113   :  { %915 = vmatpush1.bf16.msra.mxu1 %v1383_v52 }
 0x114   :  { %916 = vmatprep.subr.bf16.mxu1 %v1385_v54 }
 0x117   :  { %917 = vmatpush1.bf16.msra.mxu1 %v1389_v56  ;;  %v1656_v56 = vmov 0.0  }
 0x118   :  { %918 = vmatprep.subr.bf16.mxu1 %v1391_v58 }
 0x11b   :  { %919 = vmatpush1.bf16.msra.mxu1 %v1395_v60 }
 0x11c   :  { %920 = vmatprep.subr.bf16.mxu1 %v1397_v62 }
 0x11f   :  { %921 = vmatpush1.bf16.msra.mxu1 %v1401_v53 }
 0x122   :  { %923 = vmatmul.mubr.bf16.vlgmr.msra.gmra.mrb[4].mxu1 %v2053_v0 }
 0x123   :  { %1038 = vmatprep.mubr.bf16.mxu1 %v1655_v2 }
 0x1b4   :  { %v439_v28 = vpop.f32.mrb[0].mxu0 }
 0x1b5   :  { %v665_v30 = vpop.f32.mrb[0].mxu1  ;;  %v440_v32 = vadd.f32 %v439_v28, %v2059_v20  ;;  %v441_v34 = vpop.f32.mrb[1].mxu0 }
 0x1b6   :  { %v666_v36 = vadd.f32 %v665_v30, %v2061_v22  ;;  %v667_v38 = vpop.f32.mrb[1].mxu1  ;;  %v442_v40 = vadd.f32 %v441_v34, %v2063_v24  ;;  %v443_v42 = vpop.f32.mrb[2].mxu0 }
 0x1b7   :  { %v668_v44 = vadd.f32 %v667_v38, %v2065_v26  ;;  %v669_v46 = vpop.f32.mrb[2].mxu1  ;;  %v446_v47 = vmul.f32 0.5, %v440_v32  ;;  %v444_v49 = vpop.f32.mrb[3].mxu0  ;;  %v2095_v32 = vld [vmem:[#allocation11] sm:$0xff]  }
 0x1b8   :  { %v672_v51 = vmul.f32 0.5, %v666_v36  ;;  %v670_v52 = vpop.f32.mrb[3].mxu1  ;;  %v447_v53 = vmul.f32 0.5, %v442_v40 }
 0x1b9   :  { %v673_v54 = vmul.f32 0.5, %v668_v44  ;;  %vm450_vm0 = vcmp.ge.f32.partialorder %v446_v47, 1.0 }
 0x1ba   :  { %vm676_vm1 = vcmp.ge.f32.partialorder %v672_v51, 1.0  ;;  %v1215_v58 = vsel %vm450_vm0, 1.0, %v1656_v56  ;;  %vm451_vm2 = vcmp.ge.f32.partialorder %v447_v53, 1.0 }
 0x1bb   :  { %v2074_v60 = vsel %vm676_vm1, 0.0, %v672_v51  ;;  %v458_v62 = vpack.c.bf16 %v1215_v58, %v1215_v58  ;;  %v1216_v4 = vsel %vm451_vm2, 1.0, %v1656_v56  ;;  %vm677_vm4 = vcmp.ge.f32.partialorder %v673_v54, 1.0 }
 0x1bc   :  { %v459_v6 = vpack.c.bf16 %v1216_v4, %v1216_v4  ;;  %v2079_v10 = vsel %vm677_vm4, 0.0, %v673_v54  ;;  %v1250_v12 = vsel %vm677_vm4, 1.0, %v1656_v56  ;;  %v1249_v28 = vsel %vm676_vm1, 1.0, %v1656_v56 }
 0x1bd   :  { %v697_v8 = vsel %vm695_vm3, %v458_v62, 0  ;;  %v685_v16 = vpack.c.bf16 %v1250_v12, %v1250_v12  ;;  %v684_v30 = vpack.c.bf16 %v1249_v28, %v1249_v28 }
 0x1be   :  { %1252 = vmatprep.subr.msk.bf16.mxu0 %vm695_vm3, %v459_v6 }
 0x1bf   :  { %703 = vmatpush1.bf16.msra.mxu0 %v697_v8  ;;  %v811_v34 = vsel %vm695_vm3, %v684_v30, 0 }
 0x1c0   :  { %1255 = vmatprep.subr.msk.bf16.mxu0 %vm695_vm3, %v1986_v50  ;;  %v2102_v50 = vld [vmem:[#allocation14] sm:$0xff]  }
 0x1c2   :  { %1253 = vmatmul.mubr.msk.bf16.vlgmr.msra.gmra.mrb[4].mxu0 %vm691_vm5, %v2083_v14 }
 0x1c3   :  { %760 = vmatpush1.bf16.msra.mxu0 %v754_v18  ;;  %791 = vmatprep.mubr.bf16.mxu0 %v1655_v2 }
 0x1c4   :  { %1258 = vmatprep.subr.msk.bf16.mxu0 %vm695_vm3, %v685_v16 }
 0x1ce   :  { %1256 = vmatmul.mubr.msk.bf16.vlgmr.msra.gmra.mrb[4].mxu0 %vm691_vm5, %v2095_v32 }
 0x1cf   :  { %817 = vmatpush1.bf16.msra.mxu0 %v811_v34  ;;  %848 = vmatprep.mubr.bf16.mxu0 %v1655_v2 }
 0x1d0   :  { %945 = vmatprep.subr.bf16.mxu0 %v1848_v1 }
 0x1da   :  { %1259 = vmatmul.mubr.msk.bf16.vlgmr.msra.gmra.mrb[4].mxu0 %vm691_vm5, %v2102_v50 }
 0x1db   :  { %946 = vmatpush1.bf16.msra.mxu0 %v1853_v3  ;;  %977 = vmatprep.mubr.bf16.mxu0 %v2023_v48 }
 0x1dc   :  { %947 = vmatprep.subr.bf16.mxu0 %v1860_v5 }
 0x1df   :  { %948 = vmatpush1.bf16.msra.mxu0 %v1865_v7  ;;  %v452_v7 = vsel %vm450_vm0, 0.0, %v446_v47 }
 0x1e0   :  { %949 = vmatprep.subr.bf16.mxu0 %v1870_v9 }
 0x1e3   :  { %950 = vmatpush1.bf16.msra.mxu0 %v1874_v11 }
 0x1e4   :  { %951 = vmatprep.subr.bf16.mxu0 %v1882_v13  ;;  %v453_v13 = vsel %vm451_vm2, 0.0, %v447_v53 }
 0x1e7   :  { %952 = vmatpush1.bf16.msra.mxu0 %v1888_v15 }
 0x1e8   :  { %953 = vmatprep.subr.bf16.mxu0 %v1894_v17 }
 0x1eb   :  { %954 = vmatpush1.bf16.msra.mxu0 %v1898_v19 }
 0x1ec   :  { %955 = vmatprep.subr.bf16.mxu0 %v1906_v21 }
 0x1ef   :  { %956 = vmatpush1.bf16.msra.mxu0 %v1912_v23 }
 0x1f0   :  { %957 = vmatprep.subr.bf16.mxu0 %v1918_v25 }
 0x1f3   :  { %958 = vmatpush1.bf16.msra.mxu0 %v1922_v27 }
 0x1f4   :  { %959 = vmatprep.subr.bf16.mxu0 %v1930_v29 }
 0x1f5   :  { %v924_v1 = vpop.f32.mrb[4].mxu1 }
 0x1f6   :  { %v925_v3 = vadd.f32 %v924_v1, %v2059_v20  ;;  %v926_v5 = vpop.f32.mrb[5].mxu1 }
 0x1f7   :  { %v927_v9 = vadd.f32 %v926_v5, %v2063_v24  ;;  %v928_v11 = vpop.f32.mrb[6].mxu1  ;;  %960 = vmatpush1.bf16.msra.mxu0 %v1936_v31 }
 0x1f8   :  { %v931_v15 = vsub.f32 %v925_v3, %v452_v7  ;;  %v929_v17 = vpop.f32.mrb[7].mxu1  ;;  %961 = vmatprep.subr.bf16.mxu0 %v1942_v33 }
 0x1f9   :  { %v932_v19 = vsub.f32 %v927_v9, %v453_v13 }
 0x1fa   :  { %v933_v21 = vmul.f32 0.5, %v931_v15 }
 0x1fb   :  { %v934_v23 = vmul.f32 0.5, %v932_v19  ;;  %962 = vmatpush1.bf16.msra.mxu0 %v1946_v35  ;;  %v2201_v35 = vld [vmem:[#allocation24_spill] sm:$0xff] }
 0x1fc   :  { %v935_v25 = vadd.f32 %v933_v21, %v452_v7  ;;  %963 = vmatprep.subr.bf16.mxu0 %v1954_v37  ;;  %v2202_v37 = vld [vmem:[#allocation25_spill] sm:$0xff] }
 0x1fd   :  { %v936_v27 = vadd.f32 %v934_v23, %v453_v13 }
 0x1fe   :  { %vm937_vm6 = vcmp.ge.f32.partialorder %v935_v25, 1.0 }
 0x1ff   :  { %vm938_vm7 = vcmp.ge.f32.partialorder %v936_v27, 1.0  ;;  %v1262_v29 = vsel %vm937_vm6, 1.0, %v1656_v56  ;;  %964 = vmatpush1.bf16.msra.mxu0 %v1960_v39  ;;  %v2203_v39 = vld [vmem:[#allocation26_spill] sm:$0xff] }
 0x200   :  { %v1263_v57 = vsel %vm938_vm7, 1.0, %v1656_v56  ;;  %v943_v31 = vpack.c.bf16 %v1262_v29, %v1262_v29  ;;  %965 = vmatprep.subr.bf16.mxu0 %v1966_v41  ;;  %v2204_v41 = vld [vmem:[#allocation27_spill] sm:$0xff] }
 0x201   :  { %v944_v20 = vpack.c.bf16 %v1263_v57, %v1263_v57 }
 0x202   :  { %v1001_v33 = vsel %vm695_vm3, %v943_v31, 0 }
 0x203   :  { %1266 = vmatprep.subr.msk.bf16.mxu1 %vm695_vm3, %v944_v20  ;;  %966 = vmatpush1.bf16.msra.mxu0 %v1970_v43  ;;  %v2205_v43 = vld [vmem:[#allocation28_spill] sm:$0xff] }
 0x204   :  { %1007 = vmatpush1.bf16.msra.mxu1 %v1001_v33  ;;  %967 = vmatprep.subr.bf16.mxu0 %v1978_v45  ;;  %v1050_v45 = vsel %vm695_vm3, %v2053_v0, 0 }
 0x205   :  { %1268 = vmatprep.subr.msk.bf16.mxu1 %vm695_vm3, %v2023_v48  ;;  %v866_v48 = vpop.permute.xlu0 %865 }
 0x207   :  { %1267 = vmatmul.mubr.msk.bf16.vlgmr.msra.gmra.mrb[8].mxu1 %vm691_vm5, %v2083_v14  ;;  %968 = vmatpush1.bf16.msra.mxu0 %v2201_v35 }
 0x208   :  { %1087 = vmatprep.mubr.bf16.mxu1 %v1655_v2  ;;  %969 = vmatprep.subr.bf16.mxu0 %v2202_v37 }
 0x209   :  { %1056 = vmatpush1.bf16.msra.mxu1 %v1050_v45 }
 0x20b   :  { %970 = vmatpush1.bf16.msra.mxu0 %v2203_v39 }
 0x20c   :  { %971 = vmatprep.subr.bf16.mxu0 %v2204_v41 }
 0x20f   :  { %972 = vmatpush1.bf16.msra.mxu0 %v2205_v43 }
 0x210   :  { %973 = vmatprep.subr.bf16.mxu0 %v2008_v59  ;;  %v871_v59 = vpop.permute.xlu0 %870 }
 0x213   :  { %974 = vmatpush1.bf16.msra.mxu0 %v2011_v61  ;;  %1269 = vmatmul.mubr.msk.bf16.vlgmr.msra.gmra.mrb[8].mxu1 %vm691_vm5, %v2095_v32 }
 0x214   :  { %975 = vmatprep.subr.bf16.mxu0 %v2014_v63  ;;  %1136 = vmatprep.mubr.bf16.mxu1 %v1655_v2 }
 0x217   :  { %976 = vmatpush1.bf16.msra.mxu0 %v2017_v55 }
 0x21a   :  { %978 = vmatmul.mubr.bf16.vlgmr.msra.gmra.mrb[8].mxu0 %v2053_v0 }
 0x2ad   :  { %v850_v24 = vpop.f32.mrb[4].mxu0 }
 0x2ae   :  { %v873_v36 = vadd.f32 %v866_v48, %v850_v24  ;;  %v852_v61 = vpop.f32.mrb[5].mxu0 }
 0x2af   :  { %v874_v38 = vadd.f32 %v866_v48, %v852_v61  ;;  %v854_v63 = vpop.f32.mrb[6].mxu0 }
 0x2b0   :  { %877 = vst [vmem:[#allocation17] sm:$0xff] %v873_v36  ;;  %v875_v55 = vadd.f32 %v871_v59, %v854_v63  ;;  %v856_v40 = vpop.f32.mrb[7].mxu0 }
 0x2b1   :  { %878 = vst [vmem:[#allocation17 + $0x8] sm:$0xff] %v874_v38  ;;  %v876_v42 = vadd.f32 %v871_v59, %v856_v40 }
 0x2b2   :  { %879 = vst [vmem:[#allocation17 + $0x10] sm:$0xff] %v875_v55 }
 0x2b3   :  { %880 = vst [vmem:[#allocation17 + $0x18] sm:$0xff] %v876_v42 }
 0x2ed   :  { %v979_v0 = vpop.f32.mrb[8].mxu0 }
 0x2ee   :  { %v980_v44 = vadd.f32 %v979_v0, %v2061_v22  ;;  %v981_v46 = vpop.f32.mrb[9].mxu0 }
 0x2ef   :  { %v982_v2 = vadd.f32 %v981_v46, %v2065_v26  ;;  %v983_v47 = vpop.f32.mrb[10].mxu0 }
 0x2f0   :  { %v986_v49 = vsub.f32 %v980_v44, %v2074_v60  ;;  %v984_v51 = vpop.f32.mrb[11].mxu0 }
 0x2f1   :  { %v987_v52 = vsub.f32 %v982_v2, %v2079_v10 }
 0x2f2   :  { %v988_v53 = vmul.f32 0.5, %v986_v49 }
 0x2f3   :  { %v989_v54 = vmul.f32 0.5, %v987_v52 }
 0x2f4   :  { %v990_v58 = vadd.f32 %v988_v53, %v2074_v60 }
 0x2f5   :  { %v991_v62 = vadd.f32 %v989_v54, %v2079_v10 }
 0x2f6   :  { %vm992_vm8 = vcmp.ge.f32.partialorder %v990_v58, 1.0 }
 0x2f7   :  { %vm993_vm9 = vcmp.ge.f32.partialorder %v991_v62, 1.0  ;;  %v1264_v4 = vsel %vm992_vm8, 1.0, %v1656_v56 }
 0x2f8   :  { %v1265_v22 = vsel %vm993_vm9, 1.0, %v1656_v56  ;;  %v998_v6 = vpack.c.bf16 %v1264_v4, %v1264_v4 }
 0x2f9   :  { %v999_v26 = vpack.c.bf16 %v1265_v22, %v1265_v22 }
 0x2fa   :  { %v1099_v8 = vsel %vm695_vm3, %v998_v6, 0 }
 0x2fb   :  { %1270 = vmatprep.subr.msk.bf16.mxu1 %vm695_vm3, %v999_v26 }
 0x2fc   :  { %1105 = vmatpush1.bf16.msra.mxu1 %v1099_v8 }
 0x2ff   :  { %1271 = vmatmul.mubr.msk.bf16.vlgmr.msra.gmra.mrb[8].mxu1 %vm691_vm5, %v2102_v50 }
 0x3d2   :  { %v1138_v12 = vpop.f32.mrb[8].mxu1 }
 0x3d3   :  { %v1151_v60 = vadd.f32 %v1138_v12, %v866_v48  ;;  %v1140_v10 = vpop.f32.mrb[9].mxu1 }
 0x3d4   :  { %v1152_v14 = vadd.f32 %v1140_v10, %v866_v48  ;;  %v1142_v16 = vpop.f32.mrb[10].mxu1 }
 0x3d5   :  { %1156 = vst [vmem:[#allocation17 + $0x20] sm:$0xff] %v1151_v60  ;;  %v1153_v18 = vadd.f32 %v1142_v16, %v871_v59  ;;  %v1144_v56 = vpop.f32.mrb[11].mxu1 }
 0x3d6   :  { %1157 = vst [vmem:[#allocation17 + $0x28] sm:$0xff] %v1152_v14  ;;  %v1154_v28 = vadd.f32 %v1144_v56, %v871_v59 }
 0x3d7   :  { %1158 = vst [vmem:[#allocation17 + $0x30] sm:$0xff] %v1153_v18 }
 0x3d8   :  { %1159 = vst [vmem:[#allocation17 + $0x38] sm:$0xff] %v1154_v28 }
 0x3d9   :  { %1619 = shalt.err (!%p1616_p6)
}
 0x3da   :  { %s1620_s13 = scalar_lea.hbm %s2190_s9, 1024 }
 0x3db   :  { %p1621_p7 = scmp.ne.s32.totalorder %s2190_s9, %s1620_s13  ;;  %p1624_p8 = scmp.lt.u32.totalorder %s1620_s13, %s2190_s9 }
 0x3dd   :  { %p1626_p9 = pnand %p1624_p8, %p1621_p7 }
 0x3df   :  { %1629 = shalt.err (!%p1626_p9)
}
 0x3e0   :  { %s1658_s18 = smov 256   ;;  %s1659_s5 = smov 16  }
 0x3e1   :  { %1171 = dma.vmem_to_hbm [thread:$0]  %s1166_s21, 1024, %s2190_s9, [#allocation4], %s1658_s18, %s1658_s18, %s1659_s5  }
 0x3e2   :  { %1640 = dma.done.wait [#allocation4], 1024  }
 0x3e3   :  { %1641 = vsyncadd [#allocation4], 4294966272 }
 0x3e4   :  { %1175 = vsyncpa [#allocation3], 1 }
 0x3e5   :  { %1176 = vsyncpa [#allocation6], 1 }
 0x3e6   :  { %1177 = vsyncpa [#allocation9], 1 }
 0x3e7   :  { %1178 = vsyncpa [#allocation12], 1 }
 0x3e8   :  { %1179 = vsyncpa [#allocation15], 1 }
 0x3e9   :  { %1180 = vsyncpa [#allocation4], 1 }

</bundles_post_ra>
